<compile_context>
chip_gen: v7x
topology: tpu7x:2x2x1
jax: 0.10.0
libtpu: 0.0.40
codegen_flags: <defaults>
</compile_context>

<pallas_src>
import functools

import jax
import jax.numpy as jnp
from jax import lax
from jax.experimental import pallas as pl
from jax.experimental.pallas import tpu as pltpu


LANE_TILE = 128  # batch columns per grid step == TPU lane width


def _cond_embed_kernel(cond_ref, tab_t_ref, w1_ref, b1_ref, w2_ref, b2_ref,
                       out_ref):
    # cond_ref : (1, TB)  int32   condition ids, batch on the lane axis
    # tab_t_ref: (D, C)   wdtype  embedding table, feature-major (transposed)
    # w1_ref   : (D, D)   wdtype  lin1 weight in native PyTorch (out, in) layout
    # b1_ref   : (D, 1)   f32
    # w2_ref   : (D, D)   wdtype  lin2 weight (out, in)
    # b2_ref   : (D, 1)   f32
    # out_ref  : (D, TB)  f32     output^T, batch on lanes (lane-dense store)
    wdtype = tab_t_ref.dtype
    C = tab_t_ref.shape[1]
    TB = cond_ref.shape[1]

    cond = cond_ref[...]                                         # (1, TB)

    # Embedding gather as an exact one-hot matmul (MXU). Fine for small C;
    # for large C use a scalar-prefetch row gather instead of O(B*C*D) work.
    class_ids = lax.broadcasted_iota(jnp.int32, (C, TB), 0)      # (C, TB)
    onehot_t = (class_ids == cond).astype(wdtype)                # (C, TB)
    emb_t = jnp.dot(tab_t_ref[...], onehot_t,
                    preferred_element_type=jnp.float32)          # (D, TB) f32

    # lin1 + Swish. Activations stay f32 (v5e VPU/EUP have no bf16 path);
    # only MXU operands use the (optionally bf16) weight dtype. The cast of
    # emb_t back to wdtype is lossless (values are exact table rows).
    h = jnp.dot(w1_ref[...], emb_t.astype(wdtype),
                preferred_element_type=jnp.float32) + b1_ref[...]
    h = h * jax.nn.sigmoid(h)     # exp goes to the (otherwise idle) EUP slot

    out = jnp.dot(w2_ref[...], h.astype(wdtype),
                  preferred_element_type=jnp.float32) + b2_ref[...]
    out_ref[...] = out.astype(out_ref.dtype)                     # full 128-lane store


def prepare_params(table, w1, b1, w2, b2, *, weight_dtype=jnp.float32):
    """One-time parameter packing. Call at parameter-load time, NOT per forward.

    table: (C, D)  nn.Embedding weight
    w1,w2: (D, D)  nn.Linear weights in PyTorch (out, in) layout (kept as-is)
    b1,b2: (D,)    nn.Linear biases
    """
    D = table.shape[1]
    return dict(
        table_t=jnp.asarray(table, jnp.float32).T.astype(weight_dtype),  # (D, C)
        w1=jnp.asarray(w1, jnp.float32).astype(weight_dtype),            # (D, D)
        b1=jnp.asarray(b1, jnp.float32).reshape(D, 1),                   # (D, 1)
        w2=jnp.asarray(w2, jnp.float32).astype(weight_dtype),            # (D, D)
        b2=jnp.asarray(b2, jnp.float32).reshape(D, 1),                   # (D, 1)
    )


def condition_embedding(conditions, params, *, batch_tile=LANE_TILE):
    """conditions: (B,) integer indices. Returns (B, D) float32."""
    assert batch_tile % 128 == 0, "batch tile must be lane-aligned (x128)"
    table_t, w1, b1, w2, b2 = (params["table_t"], params["w1"], params["b1"],
                               params["w2"], params["b2"])
    D, C = table_t.shape
    B = conditions.shape[0]
    n_tiles = pl.cdiv(B, batch_tile)
    B_pad = n_tiles * batch_tile

    cond = jnp.asarray(conditions, jnp.int32).reshape(1, B)
    if B_pad != B:
        cond = jnp.pad(cond, ((0, 0), (0, B_pad - B)))  # pad ids -> index 0

    wbytes = jnp.dtype(table_t.dtype).itemsize
    cost = pl.CostEstimate(
        flops=2 * B_pad * D * (C + 2 * D),
        transcendentals=B_pad * D,
        bytes_accessed=(4 * B_pad                       # condition ids
                        + wbytes * (C * D + 2 * D * D)  # table + weights
                        + 4 * 2 * D                     # biases
                        + 4 * D * B_pad),               # output
    )

    grid_spec = pltpu.PrefetchScalarGridSpec(
        num_scalar_prefetch=0,
        grid=(n_tiles,),
        in_specs=[
            pl.BlockSpec((1, batch_tile), lambda i: (0, i)),   # cond ids
            pl.BlockSpec((D, C), lambda i: (0, 0)),            # table^T
            pl.BlockSpec((D, D), lambda i: (0, 0)),            # w1
            pl.BlockSpec((D, 1), lambda i: (0, 0)),            # b1
            pl.BlockSpec((D, D), lambda i: (0, 0)),            # w2
            pl.BlockSpec((D, 1), lambda i: (0, 0)),            # b2
        ],
        out_specs=pl.BlockSpec((D, batch_tile), lambda i: (0, i)),
    )

    out_t = pl.pallas_call(
        _cond_embed_kernel,
        out_shape=jax.ShapeDtypeStruct((D, B_pad), jnp.float32),
        grid_spec=grid_spec,
        compiler_params=pltpu.CompilerParams(
            dimension_semantics=("parallel",)),
        cost_estimate=cost,
    )(cond, table_t, w1, b1, w2, b2)

    # (D, B_pad) -> (B, D). A downstream fused Pallas kernel can consume the
    # feature-major out_t directly and skip this tiny transpose.
    return out_t.T[:B]


def condition_embedding_ref(conditions, table, w1, b1, w2, b2):
    emb = table[conditions]
    h = emb @ w1.T + b1
    h = h * jax.nn.sigmoid(h)
    return h @ w2.T + b2


if __name__ == "__main__":
    B = 300          # many condition vectors per call (amortizes call overhead)
    D = 32           # embedding_dim
    C = 10           # n_conditions

    key = jax.random.PRNGKey(0)
    k_tab, k_w1, k_b1, k_w2, k_b2, k_cond = jax.random.split(key, 6)

    # Synthetic parameters with nn.Embedding / nn.Linear shapes.
    table = jax.random.normal(k_tab, (C, D), jnp.float32)
    w1 = jax.random.normal(k_w1, (D, D), jnp.float32) * (1.0 / jnp.sqrt(D))
    b1 = jax.random.normal(k_b1, (D,), jnp.float32) * 0.01
    w2 = jax.random.normal(k_w2, (D, D), jnp.float32) * (1.0 / jnp.sqrt(D))
    b2 = jax.random.normal(k_b2, (D,), jnp.float32) * 0.01

    conditions = jax.random.randint(k_cond, (B,), 0, C, jnp.int32)

    ref = condition_embedding_ref(conditions, table, w1, b1, w2, b2)

    # f32-weight path (exact semantics of the PyTorch module).
    params_f32 = prepare_params(table, w1, b1, w2, b2)        # one-time prep
    fwd_f32 = jax.jit(functools.partial(condition_embedding, params=params_f32))
    out = jax.block_until_ready(fwd_f32(conditions))
    assert out.shape == (B, D)
    assert jnp.allclose(out, ref, atol=1e-4, rtol=1e-4), "f32 mismatch vs reference"

    # bf16-weight path (v6e/v7x MXU-friendly; f32 accumulation + f32 Swish).
    params_bf16 = prepare_params(table, w1, b1, w2, b2, weight_dtype=jnp.bfloat16)
    fwd_bf16 = jax.jit(functools.partial(condition_embedding, params=params_bf16))
    out_bf16 = jax.block_until_ready(fwd_bf16(conditions))
    assert out_bf16.shape == (B, D)
    assert jnp.allclose(out_bf16, ref, atol=2e-1, rtol=2e-1), "bf16 mismatch vs reference"

    print("KERNEL_OK")
</pallas_src>

<mosaic_0001>
module attributes {stable_mosaic.version = 11 : i64} {
  func.func @_cond_embed_kernel(%arg0: i32, %arg1: memref<1x128xi32, #tpu.memory_space<vmem>>, %arg2: memref<32x10xf32, #tpu.memory_space<vmem>>, %arg3: memref<32x32xf32, #tpu.memory_space<vmem>>, %arg4: memref<32x1xf32, #tpu.memory_space<vmem>>, %arg5: memref<32x32xf32, #tpu.memory_space<vmem>>, %arg6: memref<32x1xf32, #tpu.memory_space<vmem>>, %arg7: memref<32x128xf32, #tpu.memory_space<vmem>>) attributes {dimension_semantics = [#tpu.dimension_semantics<parallel>], iteration_bounds = array<i64: 3>, scalar_prefetch = 0 : i64, scratch_operands = 0 : i64, tpu.core_type = #tpu.core_type<tc>, window_params = [{transform_indices = @transform_0, window_bounds = array<i64: 1, 128>}, {pipeline_mode = #tpu.pipeline_mode<synchronous>, transform_indices = @transform_1, window_bounds = array<i64: 32, 10>}, {pipeline_mode = #tpu.pipeline_mode<synchronous>, transform_indices = @transform_2, window_bounds = array<i64: 32, 32>}, {pipeline_mode = #tpu.pipeline_mode<synchronous>, transform_indices = @transform_3, window_bounds = array<i64: 32, 1>}, {pipeline_mode = #tpu.pipeline_mode<synchronous>, transform_indices = @transform_4, window_bounds = array<i64: 32, 32>}, {pipeline_mode = #tpu.pipeline_mode<synchronous>, transform_indices = @transform_5, window_bounds = array<i64: 32, 1>}, {transform_indices = @transform_6, window_bounds = array<i64: 32, 128>}]} {
    %c0 = arith.constant 0 : index
    %c0_0 = arith.constant 0 : index
    %0 = vector.load %arg1[%c0, %c0_0] : memref<1x128xi32, #tpu.memory_space<vmem>>, vector<1x128xi32>
    %1 = tpu.iota {dimensions = array<i32: 0>} : vector<10x128xi32>
    %2 = vector.broadcast %0 : vector<1x128xi32> to vector<10x128xi32>
    %3 = arith.cmpi eq, %1, %2 : vector<10x128xi32>
    %4 = arith.extui %3 : vector<10x128xi1> to vector<10x128xi32>
    %5 = arith.sitofp %4 : vector<10x128xi32> to vector<10x128xf32>
    %c0_1 = arith.constant 0 : index
    %c0_2 = arith.constant 0 : index
    %6 = vector.load %arg2[%c0_1, %c0_2] : memref<32x10xf32, #tpu.memory_space<vmem>>, vector<32x10xf32>
    %cst = arith.constant dense<0.000000e+00> : vector<32x128xf32>
    %7 = tpu.matmul %6, %5, %cst {dimension_numbers = #tpu.dot_dimension_numbers<[1], [0], [0], [1], [0, 0, 1, 1], [], []>} : vector<32x10xf32>, vector<10x128xf32>, vector<32x128xf32> -> vector<32x128xf32>
    %c0_3 = arith.constant 0 : index
    %c0_4 = arith.constant 0 : index
    %8 = vector.load %arg3[%c0_3, %c0_4] : memref<32x32xf32, #tpu.memory_space<vmem>>, vector<32x32xf32>
    %cst_5 = arith.constant dense<0.000000e+00> : vector<32x128xf32>
    %9 = tpu.matmul %8, %7, %cst_5 {dimension_numbers = #tpu.dot_dimension_numbers<[1], [0], [0], [1], [0, 0, 1, 1], [], []>} : vector<32x32xf32>, vector<32x128xf32>, vector<32x128xf32> -> vector<32x128xf32>
    %c0_6 = arith.constant 0 : index
    %c0_7 = arith.constant 0 : index
    %10 = vector.load %arg4[%c0_6, %c0_7] : memref<32x1xf32, #tpu.memory_space<vmem>>, vector<32x1xf32>
    %11 = vector.broadcast %10 : vector<32x1xf32> to vector<32x128xf32>
    %12 = arith.addf %9, %11 : vector<32x128xf32>
    %13 = arith.negf %12 : vector<32x128xf32>
    %14 = math.exp %13 : vector<32x128xf32>
    %cst_8 = arith.constant 1.000000e+00 : f32
    %15 = vector.broadcast %cst_8 : f32 to vector<32x128xf32>
    %16 = arith.addf %15, %14 : vector<32x128xf32>
    %17 = arith.divf %15, %16 : vector<32x128xf32>
    %18 = arith.mulf %12, %17 : vector<32x128xf32>
    %c0_9 = arith.constant 0 : index
    %c0_10 = arith.constant 0 : index
    %19 = vector.load %arg5[%c0_9, %c0_10] : memref<32x32xf32, #tpu.memory_space<vmem>>, vector<32x32xf32>
    %cst_11 = arith.constant dense<0.000000e+00> : vector<32x128xf32>
    %20 = tpu.matmul %19, %18, %cst_11 {dimension_numbers = #tpu.dot_dimension_numbers<[1], [0], [0], [1], [0, 0, 1, 1], [], []>} : vector<32x32xf32>, vector<32x128xf32>, vector<32x128xf32> -> vector<32x128xf32>
    %c0_12 = arith.constant 0 : index
    %c0_13 = arith.constant 0 : index
    %21 = vector.load %arg6[%c0_12, %c0_13] : memref<32x1xf32, #tpu.memory_space<vmem>>, vector<32x1xf32>
    %22 = vector.broadcast %21 : vector<32x1xf32> to vector<32x128xf32>
    %23 = arith.addf %20, %22 : vector<32x128xf32>
    %c0_14 = arith.constant 0 : index
    %c0_15 = arith.constant 0 : index
    %24 = vector.load %arg7[%c0_14, %c0_15] : memref<32x128xf32, #tpu.memory_space<vmem>>, vector<32x128xf32>
    tpu.vector_store %arg7[%c0_14, %c0_15], %23 {strides = array<i32>} : memref<32x128xf32, #tpu.memory_space<vmem>>, vector<32x128xf32>,
    return
  }
  func.func @transform_0(%arg0: i32) -> (i32, i32) {
    %c0_i32 = arith.constant 0 : i32
    %c0_i32_0 = arith.constant 0 : i32
    return %c0_i32, %arg0 : i32, i32
  }
  func.func @transform_1(%arg0: i32) -> (i32, i32) {
    %c0_i32 = arith.constant 0 : i32
    %c0_i32_0 = arith.constant 0 : i32
    %c0_i32_1 = arith.constant 0 : i32
    return %c0_i32, %c0_i32_0 : i32, i32
  }
  func.func @transform_2(%arg0: i32) -> (i32, i32) {
    %c0_i32 = arith.constant 0 : i32
    %c0_i32_0 = arith.constant 0 : i32
    %c0_i32_1 = arith.constant 0 : i32
    return %c0_i32, %c0_i32_0 : i32, i32
  }
  func.func @transform_3(%arg0: i32) -> (i32, i32) {
    %c0_i32 = arith.constant 0 : i32
    %c0_i32_0 = arith.constant 0 : i32
    %c0_i32_1 = arith.constant 0 : i32
    return %c0_i32, %c0_i32_0 : i32, i32
  }
  func.func @transform_4(%arg0: i32) -> (i32, i32) {
    %c0_i32 = arith.constant 0 : i32
    %c0_i32_0 = arith.constant 0 : i32
    %c0_i32_1 = arith.constant 0 : i32
    return %c0_i32, %c0_i32_0 : i32, i32
  }
  func.func @transform_5(%arg0: i32) -> (i32, i32) {
    %c0_i32 = arith.constant 0 : i32
    %c0_i32_0 = arith.constant 0 : i32
    %c0_i32_1 = arith.constant 0 : i32
    return %c0_i32, %c0_i32_0 : i32, i32
  }
  func.func @transform_6(%arg0: i32) -> (i32, i32) {
    %c0_i32 = arith.constant 0 : i32
    %c0_i32_0 = arith.constant 0 : i32
    return %c0_i32, %arg0 : i32, i32
  }
}

</mosaic_0001>

<bundles_post_ra>
// kernel: condition_embedding.1
= control target key start
LH: loop header
LB: loop body
LE: loop exit
PB: predicated region body
PF: predicated region fallthrough
CT: control target
= control target key end

     0   :  { %11 = vsyncpa [#allocation3], 0  ;;  %s1542_s0 = inlined_call_operand.vmem [shape: s32[1,384], index: 0, kind: input, shape index: {}]   ;;  %s1543_s1 = inlined_call_operand.hbm [shape: f32[32,10], index: 1, kind: input, shape index: {}]   ;;  %s1544_s2 = inlined_call_operand.hbm [shape: f32[32,32], index: 2, kind: input, shape index: {}]   ;;  %s1545_s3 = inlined_call_operand.hbm [shape: f32[32,1], index: 3, kind: input, shape index: {}]   ;;  %s1546_s4 = inlined_call_operand.hbm [shape: f32[32,32], index: 4, kind: input, shape index: {}]   ;;  %s1547_s5 = inlined_call_operand.vmem [shape: f32[32,1], index: 5, kind: input, shape index: {}]   ;;  %s1548_s6 = inlined_call_operand.hbm [shape: f32[32,384], index: 6, kind: output, shape index: {}]  }
   0x1   :  { %12 = vsyncpa [#allocation6], 0 }
   0x2   :  { %13 = vsyncpa [#allocation9], 0 }
   0x3   :  { %14 = vsyncpa [#allocation4], 0 }
   0x4   :  { %16 = vsyncpa [#allocation4 + $0x1], 0  ;;  %s1281_s21 = smov 0   ;;  %s1283_s22 = smov 0  }
   0x5   :  { %s1285_s23 = smov 0   ;;  %s1287_s24 = smov 0  }
   0x6 LB: > { %1553 = sst [smem:[#allocation15_spill]] %s1227_s23  ;;  %s1302_s25 = sadd.s32 4294967295, %s1231_s24   ;;  %s1231_s24 = sphi %s1287_s24, %s1573_s24   ;;  %s1227_s23 = sphi %s1285_s23, %s1570_s23   ;;  %s1223_s22 = sphi %s1283_s22, %s1572_s22   ;;  %s1219_s21 = sphi %s1281_s21, %s1571_s21  }
   0x7   : > { %s819_s26 = sadd.s32 4294967294, %s1231_s24   ;;  %s1306_s27 = sadd.s32 1, %s1231_s24  }
   0x8   : > { %s160_s28 = sadd.s32 1, %s1227_s23  ;;  %s157_s29 = ssub.s32 %s1231_s24, %s1306_s27 }
   0x9   : > { %p170_p0 = scmp.ne.s32.totalorder %s1227_s23, %s1223_s22  ;;  %p158_p1 = scmp.eq.s32.totalorder %s157_s29, 0 }
   0xa   : > { %p171_p2 = scmp.eq.s32.totalorder %s1302_s25, 2  ;;  %p176_p3 = scmp.ne.s32.totalorder %s1223_s22, %s1219_s21 }
   0xb   : > { %p177_p4 = scmp.eq.s32.totalorder %s819_s26, 2  ;;  %p820_p7 = scmp.ge.s32.totalorder %s1231_s24, 1 }
   0xc   : > { %s1317_s30 = scalar_select %p158_p1, %s1227_s23, %s160_s28  }
   0xd   : > { %p1319_p5 = por %p171_p2, %p170_p0  ;;  %p1323_p6 = por %p177_p4, %p176_p3 }
   0xe   : > { %1554 = sst [smem:[#allocation16_spill]] %s1317_s30  ;;  %p184_p8 = scmp.lt.s32.totalorder %s1231_s24, 4 }
   0xf   : > { %s1555_s7 = scalar_select %p1319_p5, 1, 0 }
  0x10   : > { %s1556_s8 = scalar_select %p1323_p6, 1, 0 }
  0x11   : > { %p1549_p9 = scmp.eq.s32.totalorder %s1302_s25, 0  ;;  %p1330_p10 = pnand %p820_p7, %p184_p8 }
  0x12   : > { %s1233_s10 = smov [#allocation5]   ;;  %s1234_s13 = smov [#allocation2]  }
  0x13   : > { %s1557_s9 = scalar_select %p1330_p10, 1, 0 }
  0x14   : > { %p957_p11 = pneg %p1330_p10  ;;  %s209_s11 = sshll.u32 %s1233_s10, 4  ;;  %s1336_s11 = int_to_ptr.vmem [resolvable:$true] %s209_s11 }
  0x15   : > { %s196_s14 = sshll.u32 %s1234_s13, 4  ;;  %s1235_s15 = smov [#allocation7]   ;;  %s1344_s14 = int_to_ptr.vmem [resolvable:$true] %s196_s14 }
  0x16   : > { %p1340_p12 = pnand %p1549_p9, %p957_p11  ;;  %s1346_s16 = sshll.u32 %s1235_s15, 4  ;;  %s223_s16 = int_to_ptr.vmem [resolvable:$true] %s1346_s16 }
  0x17   : > { %s1045_s19 = scalar_lea.hbm %s1544_s2, 512 }
  0x18   : > { %p1046_p13 = scmp.ne.s32.totalorder %s1544_s2, %s1045_s19  ;;  %p1356_p0 = pneg %p1340_p12 }
  0x19   : > { %p1052_p3 = scmp.lt.u32.totalorder %s1045_s19, %s1544_s2 }
  0x1a   : > { %p1048_p1 = pnand %p1356_p0, %p1046_p13 }
  0x1c   : > { %p1049_p2 = pneg %p1048_p1 }
  0x1e   : > { %p1054_p4 = pnand %p1052_p3, %p1049_p2 }
  0x20   : > { %1057 = shalt.err (!%p1054_p4)
}
  0x21   : > { %s1058_s13 = scalar_lea.vmem %s1336_s11, 512  ;;  %p1066_p9 = scmp.lt.s32.totalorder %s1336_s11, %s1336_s11 }
  0x22   : > { %p1059_p7 = scmp.ne.s32.totalorder %s1336_s11, %s1058_s13  ;;  %p1067_p6 = scmp.lt.s32.totalorder %s1058_s13, %s1058_s13 }
  0x24   : > { %p1061_p8 = pnand %p1059_p7, %p1356_p0  ;;  %p1068_p13 = por %p1067_p6, %p1066_p9 }
  0x26   : > { %p1062_p11 = pneg %p1061_p8 }
  0x28   : > { %p1069_p1 = pnand %p1068_p13, %p1062_p11 }
  0x2a   : > { %1072 = shalt.err (!%p1069_p1)
}
  0x2b   : > { %s1236_s15 = smov 128   ;;  %s1237_s17 = smov 8  }
  0x2c   : > { %963 = dma.hbm_to_vmem [thread:$0]  (!%p1340_p12), %s1544_s2, 512, %s1336_s11, [#allocation6], %s1236_s15, %s1236_s15, %s1237_s17  }
  0x2d   : > { %s1073_s29 = scalar_lea.hbm %s1543_s1, 512 }
  0x2e   : > { %p1074_p6 = scmp.ne.s32.totalorder %s1543_s1, %s1073_s29  ;;  %p1080_p3 = scmp.lt.u32.totalorder %s1073_s29, %s1543_s1 }
  0x30   : > { %p1076_p9 = pnand %p1074_p6, %p1356_p0 }
  0x32   : > { %p1077_p2 = pneg %p1076_p9 }
  0x34   : > { %p1082_p4 = pnand %p1080_p3, %p1077_p2 }
  0x36   : > { %1085 = shalt.err (!%p1082_p4)
}
  0x37   : > { %s1086_s11 = scalar_lea.vmem %s1344_s14, 512  ;;  %p1094_p13 = scmp.lt.s32.totalorder %s1344_s14, %s1344_s14 }
  0x38   : > { %p1087_p7 = scmp.ne.s32.totalorder %s1344_s14, %s1086_s11  ;;  %p1095_p1 = scmp.lt.s32.totalorder %s1086_s11, %s1086_s11 }
  0x3a   : > { %p1089_p8 = pnand %p1087_p7, %p1356_p0  ;;  %p1096_p6 = por %p1095_p1, %p1094_p13 }
  0x3c   : > { %p1090_p11 = pneg %p1089_p8 }
  0x3e   : > { %p1097_p9 = pnand %p1096_p6, %p1090_p11 }
  0x40   : > { %1100 = shalt.err (!%p1097_p9)
}
  0x41   : > { %960 = dma.hbm_to_vmem [thread:$0]  (!%p1340_p12), %s1543_s1, 512, %s1344_s14, [#allocation3], %s1236_s15, %s1236_s15, %s1237_s17  }
  0x42   : > { %s1101_s20 = scalar_lea.hbm %s1545_s3, 512 }
  0x43   : > { %p1102_p2 = scmp.ne.s32.totalorder %s1545_s3, %s1101_s20  ;;  %p1108_p7 = scmp.lt.u32.totalorder %s1101_s20, %s1545_s3 }
  0x45   : > { %p1104_p3 = pnand %p1102_p2, %p1356_p0 }
  0x47   : > { %p1105_p4 = pneg %p1104_p3 }
  0x49   : > { %p1110_p8 = pnand %p1108_p7, %p1105_p4 }
  0x4b   : > { %1113 = shalt.err (!%p1110_p8)
}
  0x4c   : > { %s1114_s11 = scalar_lea.vmem %s223_s16, 512  ;;  %p1122_p6 = scmp.lt.s32.totalorder %s223_s16, %s223_s16 }
  0x4d   : > { %p1115_p11 = scmp.ne.s32.totalorder %s223_s16, %s1114_s11  ;;  %p1123_p9 = scmp.lt.s32.totalorder %s1114_s11, %s1114_s11 }
  0x4f   : > { %p1117_p13 = pnand %p1115_p11, %p1356_p0  ;;  %p1124_p5 = por %p1123_p9, %p1122_p6 }
  0x51   : > { %p1118_p1 = pneg %p1117_p13 }
  0x53   : > { %p1125_p10 = pnand %p1124_p5, %p1118_p1 }
  0x55   : > { %1128 = shalt.err (!%p1125_p10)
}
  0x56   : > { %966 = dma.hbm_to_vmem [thread:$0]  (!%p1340_p12), %s1545_s3, 512, %s223_s16, [#allocation6], %s1236_s15, %s1236_s15, %s1237_s17  }
  0x57   : > { %s1238_s30 = smov [#allocation8]   ;;  %s1129_s26 = scalar_lea.hbm %s1546_s4, 512 }
  0x58   : > { %s235_s18 = sshll.u32 %s1238_s30, 4  ;;  %p1130_p5 = scmp.ne.s32.totalorder %s1546_s4, %s1129_s26  ;;  %s236_s18 = int_to_ptr.vmem [resolvable:$true] %s235_s18 }
  0x59   : > { %p1136_p3 = scmp.lt.u32.totalorder %s1129_s26, %s1546_s4 }
  0x5a   : > { %p1132_p10 = pnand %p1130_p5, %p1356_p0 }
  0x5c   : > { %p1133_p2 = pneg %p1132_p10 }
  0x5e   : > { %p1138_p4 = pnand %p1136_p3, %p1133_p2 }
  0x60   : > { %1141 = shalt.err (!%p1138_p4)
}
  0x61   : > { %s1142_s16 = scalar_lea.vmem %s236_s18, 512  ;;  %p1150_p13 = scmp.lt.s32.totalorder %s236_s18, %s236_s18 }
  0x62   : > { %p1143_p7 = scmp.ne.s32.totalorder %s236_s18, %s1142_s16  ;;  %p1151_p1 = scmp.lt.s32.totalorder %s1142_s16, %s1142_s16 }
  0x64   : > { %p1145_p8 = pnand %p1143_p7, %p1356_p0  ;;  %p1152_p6 = por %p1151_p1, %p1150_p13 }
  0x66   : > { %p1146_p11 = pneg %p1145_p8 }
  0x68   : > { %p1153_p9 = pnand %p1152_p6, %p1146_p11 }
  0x6a   : > { %1156 = shalt.err (!%p1153_p9)
}
  0x6b   : > { %969 = dma.hbm_to_vmem [thread:$0]  (!%p1340_p12), %s1546_s4, 512, %s236_s18, [#allocation9], %s1236_s15, %s1236_s15, %s1237_s17  }
  0x6c   : > { %p1560_p5 = scmp.ne.s32.totalorder %s1557_s9, 0 }
  0x6d   : > { %p1561_p0 = scmp.eq.s32.totalorder (!%p1560_p5), %s1302_s25, 0 }
  0x6e   : > { %260 = sbr.rel (%p1560_p5) target bundleno = 849 (0x351), region = 44 }
  0x75   : > { %1202 = dma.done.wait (%p1561_p0), [#allocation3], 512   ;;  %p1562_p10 = pmov %p1561_p0 }
  0x76   : > { %p1563_p2 = pmov %p1561_p0 }
  0x77   : > { %1204 = vsyncadd (%p1562_p10), [#allocation3], 4294966784 }
  0x78   : > { %1206 = dma.done.wait (%p1563_p2), [#allocation6], 1024   ;;  %p1564_p3 = pmov %p1561_p0 }
  0x79   : > { %p1565_p4 = pmov %p1561_p0 }
  0x7a   : > { %1208 = vsyncadd (%p1564_p3), [#allocation6], 4294966272 }
  0x7b   : > { %1210 = dma.done.wait (%p1565_p4), [#allocation9], 512   ;;  %p1566_p12 = pmov %p1561_p0 }
  0x7c   : > { %p300_p7 = scmp.lt.s32.totalorder %s1302_s25, 2  ;;  %v304_v0 = vlaneseq  ;;  %vm321_vm0 = vcmask 80896   ;;  %vm334_vm1 = vcmask 1041408   ;;  %v317_v4 = vld [vmem:[#allocation2] sm:$0xff]  ;;  %v1239_v5 = vmov 0.0   ;;  %v318_v9 = vld [vmem:[#allocation2 + $0x8] sm:$0xff] }
  0x7d   : > { %1212 = vsyncadd (%p1566_p12), [#allocation9], 4294966784  ;;  %883 = vmatprep.mubr.msk.f32.mxu0 %vm321_vm0, %v317_v4  ;;  %v1240_v7 = vmov 1.0   ;;  %v319_v10 = vld [vmem:[#allocation2 + $0x10] sm:$0xff]  ;;  %v320_v11 = vld [vmem:[#allocation2 + $0x18] sm:$0xff]  ;;  %vm451_vm5 = vcmask 261120  }
  0x7e   : > { %s301_s9 = scalar_select %p300_p7, %s1302_s25, 2  ;;  %v305_v1 = vshrl.u32 %v304_v0, 7  ;;  %v423_v12 = vld [vmem:[#allocation5] sm:$0xff]  ;;  %v429_v14 = vld [vmem:[#allocation7 + $0x10] sm:$0xff]  ;;  %v1241_v15 = vmov 0   ;;  %v428_v16 = vld [vmem:[#allocation7 + $0x8] sm:$0xff] }
  0x7f   : > { %897 = vmatprep.mubr.msk.f32.mxu1 %vm451_vm5, %v423_v12  ;;  %v427_v13 = vld [vmem:[#allocation7] sm:$0xff]  ;;  %1027 = vset.pattern.permute.xlu0 %v1241_v15  ;;  %v430_v17 = vld [vmem:[#allocation7 + $0x18] sm:$0xff]  ;;  %v581_v18 = vld [vmem:[%s1547_s5] sm:$0xff]  ;;  %s297_s13 = sand.u32 1, %s1223_s22   ;;  %s854_s23 = sshll.u32 %s1302_s25, 7 }
  0x80   : > { %s302_s15 = scalar_lea.vmem %s1542_s0, %s301_s9  ;;  %v306_v2 = vadd.s32 8, %v305_v1  ;;  %1028 = vset.pattern.permute.xlu1 %v1241_v15  ;;  %433 = vperm.xlu0 %1027, %v427_v13   ;;  %v582_v19 = vld [vmem:[%s1547_s5 + $0x8] sm:$0xff]  ;;  %v583_v20 = vld [vmem:[%s1547_s5 + $0x10] sm:$0xff]  ;;  %v584_v21 = vld [vmem:[%s1547_s5 + $0x18] sm:$0xff]  ;;  %s831_s11 = sshll.u32 %s297_s13, 5 }
  0x81   : > { %v832_v3 = vld [vmem:[%s302_s15] ss:$0 sm:$0xff]  ;;  %443 = vperm.xlu1 %1028, %v429_v14   ;;  %v424_v28 = vld [vmem:[#allocation5 + $0x8] sm:$0xff]  ;;  %v426_v30 = vld [vmem:[#allocation5 + $0x18] sm:$0xff]  ;;  %s299_s16 = scalar_lea.vmem [#allocation10], %s831_s11  ;;  %s1499_s28 = scalar_lea.hbm %s1548_s6, %s854_s23 }
  0x82   : > { %vm311_vm2 = vcmp.eq.s32.totalorder %v305_v1, %v832_v3  ;;  %vm312_vm3 = vcmp.eq.s32.totalorder %v306_v2, %v832_v3  ;;  %v425_v29 = vld [vmem:[#allocation5 + $0x10] sm:$0xff]  ;;  %v577_v31 = vld [vmem:[#allocation8] sm:$0xff]  ;;  %v578_v2 = vld [vmem:[#allocation8 + $0x8] sm:$0xff]  ;;  %s719_s14 = sshll.u32 %s299_s16, 4  ;;  %s1501_s25 = scalar_lea.sflag [#allocation4], %s297_s13  ;;  %s1494_s14 = int_to_ptr.vmem [resolvable:$true] %s719_s14 }
  0x83   : > { %v834_v6 = vsel %vm312_vm3, 1.0, %v1239_v5  ;;  %vm918_vm4 = vmpackc.low %vm334_vm1, %vm311_vm2  ;;  %v579_v3 = vld [vmem:[#allocation8 + $0x10] sm:$0xff]  ;;  %v580_v4 = vld [vmem:[#allocation8 + $0x18] sm:$0xff]  ;;  %s1157_s15 = scalar_lea.vmem %s1494_s14, 512  ;;  %p1567_p11 = scmp.ne.s32.totalorder %s1555_s7, 0 }
  0x84   : > { %v917_v8 = vpack.c.bf16 %v834_v6, %v1240_v7  ;;  %438 = vperm.xlu0 %1027, %v428_v16   ;;  %p1158_p8 = scmp.ne.s32.totalorder %s1494_s14, %s1157_s15  ;;  %s1242_s17 = smov [#allocation10]  }
  0x85   : > { %448 = vperm.xlu1 %1028, %v430_v17   ;;  %s1161_s30 = sshll.u32 %s1242_s17, 4  ;;  %s1162_s30 = int_to_ptr.vmem [resolvable:$false] %s1161_s30 }
  0x86   : > { %919 = vmatprep.subr.msk.bf16.mxu0 %vm918_vm4, %v917_v8  ;;  %p1159_p13 = pnand %p1158_p8, %p1567_p11  ;;  %s1163_s18 = scalar_lea.vmem %s1162_s30, 1024 }
  0x87   : > { %922 = vmatpush3.bf16.msk.msra.mxu0 %vm918_vm4, %v917_v8  ;;  %p1164_p6 = scmp.lt.s32.totalorder %s1494_s14, %s1162_s30  ;;  %p1165_p9 = scmp.lt.s32.totalorder %s1163_s18, %s1157_s15 }
  0x88   : > { %587 = vperm.xlu0 %1027, %v581_v18   ;;  %p1160_p1 = pneg %p1159_p13 }
  0x89   : > { %592 = vperm.xlu1 %1028, %v582_v19   ;;  %p1166_p5 = por %p1165_p9, %p1164_p6 }
  0x8a   : > { %884 = vmatmul.mubr.msk.f32.vlgmr.msra.gmra.mrb[0].mxu0 %vm321_vm0, %v318_v9 }
  0x8b   : > { %886 = vmatprep.mubr.msk.f32.mxu0 %vm321_vm0, %v319_v10  ;;  %p1167_p0 = pnand %p1166_p5, %p1160_p1 }
  0x8c   : > { %597 = vperm.xlu0 %1027, %v583_v20  }
  0x8d   : > { %602 = vperm.xlu1 %1028, %v584_v21  }
  0x8e   : > { %887 = vmatmul.mubr.msk.f32.gmra.mrb[2].mxu0 %vm321_vm0, %v320_v11 }
  0x8f   : > { %911 = vmatprep.mubr.msk.f32.mxu0 %vm451_vm5, %v577_v31 }
  0xff   : > { %v434_v32 = vpop.permute.xlu0 %433 }
 0x100   : > { %v444_v33 = vpop.permute.xlu1 %443 }
 0x103   : > { %v439_v34 = vpop.permute.xlu0 %438 }
 0x104   : > { %v449_v40 = vpop.permute.xlu1 %448 }
 0x107   : > { %v588_v6 = vpop.permute.xlu0 %587 }
 0x108   : > { %v593_v5 = vpop.permute.xlu1 %592 }
 0x10b   : > { %v598_v13 = vpop.permute.xlu0 %597 }
 0x10c   : > { %v603_v11 = vpop.permute.xlu1 %602 }
 0x15d   : > { %v885_v22 = vpop.f32.mrb[0].mxu0 }
 0x15e   : > { %v404_v23 = vpop.f32.mrb[1].mxu0 }
 0x15f   : > { %v923_v24 = vpack.c.bf16 %v885_v22, %v404_v23 }
 0x161   : > { %v888_v25 = vpop.f32.mrb[2].mxu0  ;;  %924 = vmatprep.subr.bf16.mxu1 %v923_v24 }
 0x162   : > { %v414_v26 = vpop.f32.mrb[3].mxu0  ;;  %926 = vmatpush3.bf16.msra.mxu1 %v923_v24 }
 0x163   : > { %v927_v27 = vpack.c.bf16 %v888_v25, %v414_v26 }
 0x165   : > { %928 = vmatprep.subr.bf16.mxu1 %v927_v27 }
 0x166   : > { %930 = vmatpush3.bf16.msra.mxu1 %v927_v27 }
 0x169   : > { %898 = vmatmul.mubr.msk.f32.vlgmr.msra.gmra.mrb[0].mxu1 %vm451_vm5, %v424_v28 }
 0x16a   : > { %900 = vmatprep.mubr.msk.f32.mxu1 %vm451_vm5, %v425_v29 }
 0x16d   : > { %901 = vmatmul.mubr.msk.f32.gmra.mrb[2].mxu1 %vm451_vm5, %v426_v30 }
 0x23c   : > { %v899_v35 = vpop.f32.mrb[0].mxu1 }
 0x23d   : > { %v536_v36 = vadd.f32 %v899_v35, %v439_v34  ;;  %v530_v37 = vpop.f32.mrb[1].mxu1 }
 0x23e   : > { %v531_v38 = vadd.f32 %v530_v37, %v434_v32 }
 0x23f   : > { %v846_v39 = vmul.f32 -1.442695, %v536_v36 }
 0x240   : > { %v845_v41 = vmul.f32 -1.442695, %v531_v38  ;;  %v902_v42 = vpop.f32.mrb[2].mxu1 }
 0x241   : > { %1029 = vpow2.f32 %v846_v39  ;;  %v546_v43 = vadd.f32 %v902_v42, %v449_v40  ;;  %v540_v44 = vpop.f32.mrb[3].mxu1 }
 0x242   : > { %1031 = vpow2.f32 %v845_v41  ;;  %v541_v45 = vadd.f32 %v540_v44, %v444_v33 }
 0x243   : > { %v848_v46 = vmul.f32 -1.442695, %v546_v43 }
 0x244   : > { %v847_v47 = vmul.f32 -1.442695, %v541_v45 }
 0x245   : > { %1033 = vpow2.f32 %v848_v46 }
 0x246   : > { %1035 = vpow2.f32 %v847_v47 }
 0x24b   : > { %v1030_v48 = vpop.eup %1029 }
 0x24c   : > { %v1032_v49 = vpop.eup %1031  ;;  %v562_v50 = vadd.f32 1.0, %v1030_v48 }
 0x24d   : > { %v561_v51 = vadd.f32 1.0, %v1032_v49 }
 0x24e   : > { %1037 = vrcp.f32 %v562_v50 }
 0x24f   : > { %v1034_v52 = vpop.eup %1033  ;;  %1039 = vrcp.f32 %v561_v51 }
 0x250   : > { %v1036_v53 = vpop.eup %1035  ;;  %v564_v54 = vadd.f32 1.0, %v1034_v52 }
 0x251   : > { %v563_v55 = vadd.f32 1.0, %v1036_v53 }
 0x252   : > { %1041 = vrcp.f32 %v564_v54 }
 0x253   : > { %1043 = vrcp.f32 %v563_v55 }
 0x258   : > { %v1038_v56 = vpop.eup %1037 }
 0x259   : > { %v1040_v57 = vpop.eup %1039  ;;  %v574_v58 = vmul.f32 %v1038_v56, %v536_v36 }
 0x25a   : > { %v573_v59 = vmul.f32 %v1040_v57, %v531_v38 }
 0x25c   : > { %v1042_v60 = vpop.eup %1041  ;;  %v931_v61 = vpack.c.bf16 %v574_v58, %v573_v59 }
 0x25d   : > { %v1044_v62 = vpop.eup %1043  ;;  %v576_v63 = vmul.f32 %v1042_v60, %v546_v43 }
 0x25e   : > { %v575_v0 = vmul.f32 %v1044_v62, %v541_v45  ;;  %932 = vmatprep.subr.bf16.mxu0 %v931_v61 }
 0x25f   : > { %934 = vmatpush3.bf16.msra.mxu0 %v931_v61 }
 0x260   : > { %v935_v1 = vpack.c.bf16 %v576_v63, %v575_v0 }
 0x262   : > { %936 = vmatprep.subr.bf16.mxu0 %v935_v1 }
 0x263   : > { %938 = vmatpush3.bf16.msra.mxu0 %v935_v1 }
 0x266   : > { %912 = vmatmul.mubr.msk.f32.vlgmr.msra.gmra.mrb[4].mxu0 %vm451_vm5, %v578_v2 }
 0x267   : > { %914 = vmatprep.mubr.msk.f32.mxu0 %vm451_vm5, %v579_v3 }
 0x26a   : > { %915 = vmatmul.mubr.msk.f32.gmra.mrb[6].mxu0 %vm451_vm5, %v580_v4 }
 0x339   : > { %v913_v7 = vpop.f32.mrb[4].mxu0 }
 0x33a   : > { %v689_v8 = vadd.f32 %v913_v7, %v593_v5  ;;  %v683_v9 = vpop.f32.mrb[5].mxu0 }
 0x33b   : > { %v684_v10 = vadd.f32 %v683_v9, %v588_v6 }
 0x33c   : > { %703 = vst [vmem:[%s299_s16 + $0x8] sm:$0xff] %v689_v8 }
 0x33d   : > { %702 = vst [vmem:[%s299_s16] sm:$0xff] %v684_v10  ;;  %v916_v12 = vpop.f32.mrb[6].mxu0 }
 0x33e   : > { %v699_v14 = vadd.f32 %v916_v12, %v603_v11  ;;  %v693_v15 = vpop.f32.mrb[7].mxu0 }
 0x33f   : > { %v694_v16 = vadd.f32 %v693_v15, %v598_v13 }
 0x340   : > { %705 = vst [vmem:[%s299_s16 + $0x18] sm:$0xff] %v699_v14 }
 0x341   : > { %704 = vst [vmem:[%s299_s16 + $0x10] sm:$0xff] %v694_v16 }
 0x342   : > { %1170 = shalt.err (!%p1167_p0)
}
 0x343   : > { %s1171_s19 = scalar_lea.hbm %s1499_s28, 512  ;;  %s1175_s29 = scalar_lea.hbm %s1548_s6, 1536 }
 0x344   : > { %p1172_p10 = scmp.ne.s32.totalorder %s1499_s28, %s1171_s19  ;;  %p1176_p4 = scmp.lt.u32.totalorder %s1499_s28, %s1548_s6 }
 0x345   : > { %p1177_p12 = scmp.lt.u32.totalorder %s1175_s29, %s1171_s19  ;;  %p1179_p8 = scmp.lt.u32.totalorder %s1171_s19, %s1499_s28 }
 0x346   : > { %p1173_p2 = pnand %p1172_p10, %p1567_p11 }
 0x347   : > { %p1178_p7 = por %p1177_p12, %p1176_p4 }
 0x348   : > { %p1174_p3 = pneg %p1173_p2 }
 0x349   : > { %p1180_p13 = por %p1179_p8, %p1178_p7 }
 0x34b   : > { %p1181_p1 = pnand %p1180_p13, %p1174_p3 }
 0x34d   : > { %1184 = shalt.err (!%p1181_p1)
}
 0x34e   : > { %s1243_s11 = smov 128   ;;  %s1244_s16 = smov 384  }
 0x34f   : > { %s1245_s23 = smov 8  }
 0x350   : > { %955 = dma.vmem_to_hbm [thread:$0]  (%p1567_p11), %s1494_s14, 512, %s1499_s28, %s1501_s25, %s1243_s11, %s1244_s16, %s1245_s23  }
 0x351 PF: > { %p982_p6 = scmp.ge.s32.totalorder %s1231_s24, 2  ;;  %s734_s9 = sand.u32 1, %s1219_s21  }
 0x352   : > { %p1568_p9 = scmp.ne.s32.totalorder %s1556_s8, 0  ;;  %s735_s12 = scalar_lea.sflag [#allocation4], %s734_s9 }
 0x354   : > { %p971_p5 = pnand %p982_p6, %p1568_p9 }
 0x356   : > { %1214 = dma.done.wait (!%p971_p5), %s735_s12, 512  }
 0x357   : > { %1216 = vsyncadd (!%p971_p5), %s735_s12, 4294966784  ;;  %s1569_s15 = sld [smem:[#allocation15_spill]]  ;;  %s1570_s23 = sld [smem:[#allocation16_spill]] }
 0x358   : > { %p19_p0 = scmp.ge.s32.totalorder %s1306_s27, 5   ;;  %s1571_s21 = smov %s1223_s22 }
 0x359   : > { %s1573_s24 = smov %s1306_s27 }
 0x35a   :  { %21 = sbr.rel (!%p19_p0) target bundleno = 6 (0x6), region = 96 }
 0x35d   : > { %s1572_s22 = smov %s1569_s15 }
 0x361   :  { %740 = vsyncpa [#allocation3], 1 }
 0x362   :  { %742 = vsyncpa [#allocation3 + $0x1], 1 }
 0x363   :  { %743 = vsyncpa [#allocation6], 1 }
 0x364   :  { %744 = vsyncpa [#allocation9], 1 }
 0x365   :  { %745 = vsyncpa [#allocation4], 1 }
 0x366   :  { %747 = vsyncpa [#allocation4 + $0x1], 1 }

</bundles_post_ra>
